<compile_context>
chip_gen: v6e
topology: v6e:2x2x1
jax: 0.10.0
libtpu: 0.0.40
codegen_flags: <defaults>
</compile_context>

<pallas_src>
import math

import numpy as np
import jax
import jax.numpy as jnp
from jax import lax
from jax.experimental import pallas as pl
from jax.experimental.pallas import tpu as pltpu


NUM_CLASSES = 7          # labels 0..5 are objects, 6 is the "no-object" class
_EPS = 1e-7
LANES = 128              # proposals / matched boxes live on lanes
C_PAD = 8                # classes padded onto sublanes (7 -> 8)
BOX_ROWS = 16            # sublane rows of the per-batch box slab (see kernel)
_NEG = -1e30             # pad logit for the unused class row


# ----------------------------------------------------------------------------
# Fused per-batch loss kernel.  grid = (B,).  Per grid step (one batch elem):
#
#   boxes slab (16, 128): rows 0-3  src  xc, yc, w, h   (matched, M on lanes)
#                         rows 4-7  tgt  xc, yc, w, h
#                         row  8    atan(src_w / src_h)
#                         row  9    atan(tgt_w / tgt_h)
#                         row 10    per-lane weight = 1/(n_box_batches * M)
#                                   on valid lanes, 0 elsewhere (also the mask)
#                         rows 11-15 zero
#   logits slab (8, 128): classes on sublanes (row 7 = -1e30 pad),
#                         proposals on lanes
#   labels      (1, 128): per-proposal target class (6 on non-matched rows)
#
# Outputs:
#   ce_out  (B, 8, 128): per-proposal CE loss (broadcast over sublanes)
#   scalars (1, 128):    lane 0 = final CIoU loss, lane 1 = final smooth-L1
#
# The batch axis accumulates CIoU/smooth-L1 into VMEM scratch, so it must be
# "arbitrary" (a per-core tree-reduce would be needed for "parallel" on v7x;
# with B this small it is not worth it).
# ----------------------------------------------------------------------------
def _fused_loss_kernel(boxes_ref, logits_ref, labels_ref,
                       ce_ref, scal_ref, acc_ciou, acc_l1):
    b = pl.program_id(0)
    nb = pl.num_programs(0)

    @pl.when(b == 0)
    def _init():
        acc_ciou[...] = jnp.zeros_like(acc_ciou)
        acc_l1[...] = jnp.zeros_like(acc_l1)

    # ---------------- per-proposal cross entropy (lane-dense) ----------------
    x = logits_ref[0]                                    # (C_PAD, LANES)
    lab = labels_ref[0]                                  # (1, LANES) int32
    m = jnp.max(x, axis=0, keepdims=True)
    lse = m + jnp.log(jnp.sum(jnp.exp(x - m), axis=0, keepdims=True))
    cls = lax.broadcasted_iota(jnp.int32, x.shape, 0)
    sel = jnp.sum(jnp.where(cls == lab, x, 0.0), axis=0, keepdims=True)
    ce_row = lse - sel                                   # -log_softmax[label]
    ce_ref[0] = jnp.broadcast_to(ce_row, (C_PAD, LANES))  # unmasked lane store

    # ---------------- matched-box CIoU + smooth-L1 losses --------------------
    bx = boxes_ref[0]                                    # (BOX_ROWS, LANES)
    sxc, syc, sw, sh = bx[0:1], bx[1:2], bx[2:3], bx[3:4]
    txc, tyc, tw, th = bx[4:5], bx[5:6], bx[6:7], bx[7:8]
    atan_s, atan_t = bx[8:9], bx[9:10]
    wrow = bx[10:11]                                     # weight * valid mask

    # ---- CIoU loss (standard complete-IoU) ----
    # TODO(synk): the reference imports `CIoU` from an external file; the
    # standard CIoU loss (1 - IoU + rho^2/c^2 + alpha*v) is implemented here.
    sx1, sx2 = sxc - 0.5 * sw, sxc + 0.5 * sw
    sy1, sy2 = syc - 0.5 * sh, syc + 0.5 * sh
    tx1, tx2 = txc - 0.5 * tw, txc + 0.5 * tw
    ty1, ty2 = tyc - 0.5 * th, tyc + 0.5 * th

    iw = jnp.maximum(jnp.minimum(sx2, tx2) - jnp.maximum(sx1, tx1), 0.0)
    ih = jnp.maximum(jnp.minimum(sy2, ty2) - jnp.maximum(sy1, ty1), 0.0)
    inter = iw * ih
    union = sw * sh + tw * th - inter + _EPS
    iou = inter * pl.reciprocal(union, approx=True)

    cw = jnp.maximum(sx2, tx2) - jnp.minimum(sx1, tx1)
    ch = jnp.maximum(sy2, ty2) - jnp.minimum(sy1, ty1)
    c2 = cw * cw + ch * ch + _EPS
    rho2 = (txc - sxc) * (txc - sxc) + (tyc - syc) * (tyc - syc)

    d_atan = atan_t - atan_s
    v = (4.0 / (math.pi ** 2)) * d_atan * d_atan
    alpha = v * pl.reciprocal(1.0 - iou + v + _EPS, approx=True)
    ciou = iou - (rho2 * pl.reciprocal(c2, approx=True) + v * alpha)
    ciou_loss = 1.0 - ciou                               # (1, LANES)

    # ---- smooth-L1 regression loss: pure VPU sum of the four terms ----
    dx = (txc - sxc) * pl.reciprocal(sw, approx=True)
    dy = (tyc - syc) * pl.reciprocal(sh, approx=True)
    dw = jnp.log(tw) - jnp.log(sw)
    dh = jnp.log(th) - jnp.log(sh)

    def _smooth_l1(z):
        az = jnp.abs(z)
        return jnp.where(az < 1.0, 0.5 * z * z, az - 0.5)

    l1_row = _smooth_l1(dx) + _smooth_l1(dy) + _smooth_l1(dw) + _smooth_l1(dh)

    # accumulate per-lane weighted contributions; cross-lane reduce deferred
    acc_ciou[...] += ciou_loss * wrow
    acc_l1[...] += l1_row * wrow

    @pl.when(b == nb - 1)
    def _finalize():
        ciou_total = jnp.sum(acc_ciou[...])
        l1_total = jnp.sum(acc_l1[...])
        lane = lax.broadcasted_iota(jnp.int32, (1, LANES), 1)
        scal_ref[...] = (jnp.where(lane == 0, ciou_total, 0.0)
                         + jnp.where(lane == 1, l1_total, 0.0))


def _fused_loss_call(boxes, logits, labels):
    """boxes (B,16,128) f32, logits (B,8,128) f32, labels (B,1,128) i32."""
    b = boxes.shape[0]
    ce, scal = pl.pallas_call(
        _fused_loss_kernel,
        out_shape=(jax.ShapeDtypeStruct((b, C_PAD, LANES), jnp.float32),
                   jax.ShapeDtypeStruct((1, LANES), jnp.float32)),
        grid_spec=pltpu.PrefetchScalarGridSpec(
            num_scalar_prefetch=0,
            grid=(b,),
            in_specs=[
                pl.BlockSpec((1, BOX_ROWS, LANES), lambda i: (i, 0, 0)),
                pl.BlockSpec((1, C_PAD, LANES), lambda i: (i, 0, 0)),
                pl.BlockSpec((1, 1, LANES), lambda i: (i, 0, 0)),
            ],
            out_specs=(
                pl.BlockSpec((1, C_PAD, LANES), lambda i: (i, 0, 0)),
                pl.BlockSpec((1, LANES), lambda i: (0, 0)),
            ),
            scratch_shapes=[pltpu.VMEM((1, LANES), jnp.float32),
                            pltpu.VMEM((1, LANES), jnp.float32)]),
        compiler_params=pltpu.CompilerParams(
            dimension_semantics=("arbitrary",)),   # batch axis accumulates
    )(boxes, logits, labels)
    return ce, scal


# ----------------------------------------------------------------------------
# Host-side slab construction (static match indices -> lane-dense slabs).
# ----------------------------------------------------------------------------
def _build_slabs(src, tgt, match_idx):
    n_batch = len(src)
    n_box_batches = sum(1 for mi in match_idx if not bool(mi['nonOJ_all']))

    # benign defaults: unit boxes at (0.5, 0.5) keep div/log finite on padded
    # lanes (their loss contribution is zeroed by the weight row anyway).
    box_default = np.zeros((BOX_ROWS, LANES), np.float32)
    box_default[[0, 1, 4, 5], :] = 0.5       # xc, yc
    box_default[[2, 3, 6, 7], :] = 1.0       # w, h
    box_default[[8, 9], :] = math.pi / 4.0   # atan(1/1)

    boxes, logits, labels = [], [], []
    for b in range(n_batch):
        mi = match_idx[b]
        q = src[b]['category'].shape[0]

        # ---- logits slab: classes on sublanes, proposals on lanes ----
        lg = jnp.zeros((C_PAD, LANES), jnp.float32)
        lg = lg.at[:NUM_CLASSES, :q].set(
            jnp.transpose(src[b]['category'].astype(jnp.float32)))
        lg = lg.at[NUM_CLASSES:, :].set(_NEG)
        logits.append(lg)

        # ---- labels: "no-object" everywhere, tgt class on matched rows ----
        lab = jnp.full((LANES,), NUM_CLASSES - 1, jnp.int32)
        if not bool(mi['nonOJ_all']):
            src_idx = np.asarray(mi['src_idx'])
            tgt_idx = np.asarray(mi['tgt_idx'])
            lab = lab.at[src_idx].set(
                jnp.asarray(tgt[b]['category'])[tgt_idx].astype(jnp.int32))
        labels.append(lab.reshape(1, LANES))

        # ---- box slab ----
        slab = jnp.asarray(box_default)
        if not bool(mi['nonOJ_all']) and len(mi['src_idx']) > 0:
            src_idx = np.asarray(mi['src_idx'])
            tgt_idx = np.asarray(mi['tgt_idx'])
            m = len(src_idx)
            ms = src[b]['bbox'][src_idx].astype(jnp.float32)     # (M, 4)
            mt = tgt[b]['bbox'][tgt_idx].astype(jnp.float32)     # (M, 4)
            coord = jnp.transpose(jnp.concatenate([ms, mt], axis=-1))  # (8, M)
            slab = slab.at[0:8, :m].set(coord)
            slab = slab.at[8, :m].set(jnp.arctan(ms[:, 2] / ms[:, 3]))
            slab = slab.at[9, :m].set(jnp.arctan(mt[:, 2] / mt[:, 3]))
            slab = slab.at[10, :m].set(1.0 / float(n_box_batches * m))
        boxes.append(slab)

    return (jnp.stack(boxes, axis=0),
            jnp.stack(logits, axis=0),
            jnp.stack(labels, axis=0),
            n_box_batches)


# ----------------------------------------------------------------------------
# compute_classify_loss sampling glue — uses the per-row CE produced by the
# fused kernel (hard negatives via top_k, random negatives via permutation).
# ----------------------------------------------------------------------------
def _classify_loss(ce_row, mi, key):
    oj_mask = np.asarray(mi['OJ_mask'])
    non_idx = np.nonzero(~oj_mask)[0]                    # static numpy indices
    nonOJ_loss = ce_row[non_idx]                         # (Nn,)
    nn = int(nonOJ_loss.shape[0])
    nonOJ_sorted = lax.top_k(nonOJ_loss, nn)[0]          # descending sort

    if bool(mi['nonOJ_all']):
        hard = nonOJ_sorted[:5]
        rest = nonOJ_sorted[5:]
        perm = jax.random.permutation(key, rest.shape[0])
        rand = rest[perm[:5]]
        return jnp.mean(jnp.concatenate([hard, rand], axis=-1))

    src_idx = np.asarray(mi['src_idx'])
    OJ_loss = ce_row[src_idx]                            # CE w/ tgt labels
    oj_num = max(int(OJ_loss.shape[0]) // 2, 1)
    hard = nonOJ_sorted[:oj_num]
    rest = nonOJ_sorted[oj_num:]
    if rest.shape[0] != 0:
        perm = jax.random.permutation(key, rest.shape[0])
        rand = rest[perm[:oj_num]]
        nonOJ_sel = jnp.concatenate([hard, rand], axis=-1)
    else:
        nonOJ_sel = hard
    return jnp.mean(OJ_loss) + jnp.mean(nonOJ_sel)


# ----------------------------------------------------------------------------
# compute_segmentation_loss.forward
# ----------------------------------------------------------------------------
def segmentation_loss_forward(src, tgt, match_idx, key):
    boxes, logits, labels, n_box_batches = _build_slabs(src, tgt, match_idx)
    ce, scal = _fused_loss_call(boxes, logits, labels)   # single kernel launch

    cat_list = []
    for b in range(len(src)):
        kb = jax.random.fold_in(key, b)
        cat_list.append(_classify_loss(ce[b, 0, :], match_idx[b], kb))

    if n_box_batches > 0:
        ciou_loss = scal[0, 0]
        l1_loss = scal[0, 1]
    else:
        # TODO(synk): torch reference would raise on an empty stack here;
        # return 0 for the box terms when no batch element has matches.
        ciou_loss = jnp.asarray(0.0, jnp.float32)
        l1_loss = jnp.asarray(0.0, jnp.float32)

    return {'CIOULoss': ciou_loss,
            'smoothL1loss': l1_loss,
            'categoryloss': jnp.mean(jnp.stack(cat_list, axis=0))}


# ----------------------------------------------------------------------------
# main
# ----------------------------------------------------------------------------
if __name__ == "__main__":
    N_BATCH = 2      # batch size
    Q = 16           # proposals / queries per image
    T = 4            # ground-truth objects per image
    C = NUM_CLASSES  # 7 classes (6 objects + no-object)

    root_key = jax.random.PRNGKey(0)
    src, tgt, match_idx = [], [], []
    for b in range(N_BATCH):
        kb = jax.random.fold_in(root_key, 100 + b)
        k1, k2, k3, k4, k5, k6 = jax.random.split(kb, 6)
        src_bbox = jnp.concatenate(
            [jax.random.uniform(k1, (Q, 2), minval=0.2, maxval=0.8),
             jax.random.uniform(k2, (Q, 2), minval=0.05, maxval=0.3)], axis=-1)
        tgt_bbox = jnp.concatenate(
            [jax.random.uniform(k3, (T, 2), minval=0.2, maxval=0.8),
             jax.random.uniform(k4, (T, 2), minval=0.05, maxval=0.3)], axis=-1)
        src_cat = jax.random.normal(k5, (Q, C), dtype=jnp.float32)
        tgt_cat = jax.random.randint(k6, (T,), 0, C - 1, dtype=jnp.int32)
        proposal_center = jax.random.uniform(k1, (Q, 2))

        src_idx = np.array([2, 5, 9, 14], dtype=np.int64) if b == 0 else \
                  np.array([0, 3, 7, 11], dtype=np.int64)
        tgt_idx = np.arange(T, dtype=np.int64)
        oj_mask = np.zeros((Q,), dtype=bool)
        oj_mask[src_idx] = True

        src.append({'proposal_center': proposal_center,
                    'bbox': src_bbox,
                    'category': src_cat})
        tgt.append({'bbox': tgt_bbox, 'category': tgt_cat})
        match_idx.append({'src_idx': src_idx,
                          'tgt_idx': tgt_idx,
                          'OJ_mask': oj_mask,
                          'nonOJ_all': False})

    sample_key = jax.random.PRNGKey(42)   # deterministic negative sampling
    out = segmentation_loss_forward(src, tgt, match_idx, sample_key)
    out = {k: jax.block_until_ready(v) for k, v in out.items()}

    assert all(np.isfinite(np.asarray(v)) for v in out.values())
    print("KERNEL_OK")
</pallas_src>

<mosaic_0001>
module attributes {stable_mosaic.version = 11 : i64} {
  func.func @_fused_loss_kernel(%arg0: i32, %arg1: memref<1x16x128xf32, #tpu.memory_space<vmem>>, %arg2: memref<1x8x128xf32, #tpu.memory_space<vmem>>, %arg3: memref<1x1x128xi32, #tpu.memory_space<vmem>>, %arg4: memref<1x8x128xf32, #tpu.memory_space<vmem>>, %arg5: memref<1x128xf32, #tpu.memory_space<vmem>>, %arg6: memref<1x128xf32, #tpu.memory_space<vmem>>, %arg7: memref<1x128xf32, #tpu.memory_space<vmem>>) attributes {dimension_semantics = [#tpu.dimension_semantics<arbitrary>], iteration_bounds = array<i64: 2>, scalar_prefetch = 0 : i64, scratch_operands = 2 : i64, tpu.core_type = #tpu.core_type<tc>, window_params = [{transform_indices = @transform_0, window_bounds = array<i64: 1, 16, 128>}, {transform_indices = @transform_1, window_bounds = array<i64: 1, 8, 128>}, {transform_indices = @transform_2, window_bounds = array<i64: 1, 1, 128>}, {transform_indices = @transform_3, window_bounds = array<i64: 1, 8, 128>}, {pipeline_mode = #tpu.pipeline_mode<synchronous>, transform_indices = @transform_4, window_bounds = array<i64: 1, 128>}]} {
    %c0_i32 = arith.constant 0 : i32
    %0 = arith.cmpi eq, %arg0, %c0_i32 : i32
    %1 = arith.extui %0 : i1 to i32
    %c0_i32_0 = arith.constant 0 : i32
    %2 = arith.cmpi ne, %1, %c0_i32_0 : i32
    scf.if %2 {
      %cst_52 = arith.constant 0.000000e+00 : f32
      %183 = vector.broadcast %cst_52 : f32 to vector<1x128xf32>
      %c0_53 = arith.constant 0 : index
      %c0_54 = arith.constant 0 : index
      %184 = vector.load %arg6[%c0_53, %c0_54] : memref<1x128xf32, #tpu.memory_space<vmem>>, vector<1x128xf32>
      tpu.vector_store %arg6[%c0_53, %c0_54], %183 {strides = array<i32>} : memref<1x128xf32, #tpu.memory_space<vmem>>, vector<1x128xf32>,
      %cst_55 = arith.constant 0.000000e+00 : f32
      %185 = vector.broadcast %cst_55 : f32 to vector<1x128xf32>
      %c0_56 = arith.constant 0 : index
      %c0_57 = arith.constant 0 : index
      %186 = vector.load %arg7[%c0_56, %c0_57] : memref<1x128xf32, #tpu.memory_space<vmem>>, vector<1x128xf32>
      tpu.vector_store %arg7[%c0_56, %c0_57], %185 {strides = array<i32>} : memref<1x128xf32, #tpu.memory_space<vmem>>, vector<1x128xf32>,
    } else {
    }
    %c0 = arith.constant 0 : index
    %c0_1 = arith.constant 0 : index
    %c0_2 = arith.constant 0 : index
    %3 = vector.load %arg2[%c0, %c0_1, %c0_2] : memref<1x8x128xf32, #tpu.memory_space<vmem>>, vector<1x8x128xf32>
    %4 = vector.shape_cast %3 : vector<1x8x128xf32> to vector<8x128xf32>
    %c0_3 = arith.constant 0 : index
    %c0_4 = arith.constant 0 : index
    %c0_5 = arith.constant 0 : index
    %5 = vector.load %arg3[%c0_3, %c0_4, %c0_5] : memref<1x1x128xi32, #tpu.memory_space<vmem>>, vector<1x1x128xi32>
    %6 = vector.shape_cast %5 : vector<1x1x128xi32> to vector<1x128xi32>
    %cst = arith.constant dense<0xFF800000> : vector<128xf32>
    %7 = vector.multi_reduction <maximumf>, %4, %cst [0] : vector<8x128xf32> to vector<128xf32>
    %8 = vector.shape_cast %7 : vector<128xf32> to vector<1x128xf32>
    %9 = vector.broadcast %8 : vector<1x128xf32> to vector<8x128xf32>
    %10 = arith.subf %4, %9 : vector<8x128xf32>
    %11 = math.exp %10 : vector<8x128xf32>
    %cst_6 = arith.constant dense<0.000000e+00> : vector<128xf32>
    %12 = vector.multi_reduction <add>, %11, %cst_6 [0] : vector<8x128xf32> to vector<128xf32>
    %13 = vector.shape_cast %12 : vector<128xf32> to vector<1x128xf32>
    %14 = math.log %13 : vector<1x128xf32>
    %15 = arith.addf %8, %14 : vector<1x128xf32>
    %16 = tpu.iota {dimensions = array<i32: 0>} : vector<8x128xi32>
    %17 = vector.broadcast %6 : vector<1x128xi32> to vector<8x128xi32>
    %18 = arith.cmpi eq, %16, %17 : vector<8x128xi32>
    %cst_7 = arith.constant 0.000000e+00 : f32
    %19 = vector.broadcast %cst_7 : f32 to vector<8x128xf32>
    %20 = arith.select %18, %4, %19 : vector<8x128xi1>, vector<8x128xf32>
    %cst_8 = arith.constant dense<0.000000e+00> : vector<128xf32>
    %21 = vector.multi_reduction <add>, %20, %cst_8 [0] : vector<8x128xf32> to vector<128xf32>
    %22 = vector.shape_cast %21 : vector<128xf32> to vector<1x128xf32>
    %23 = arith.subf %15, %22 : vector<1x128xf32>
    %24 = vector.shape_cast %23 : vector<1x128xf32> to vector<1x128xf32>
    %25 = vector.broadcast %24 : vector<1x128xf32> to vector<8x128xf32>
    %c0_9 = arith.constant 0 : index
    %c0_10 = arith.constant 0 : index
    %c0_11 = arith.constant 0 : index
    %26 = vector.load %arg4[%c0_9, %c0_10, %c0_11] : memref<1x8x128xf32, #tpu.memory_space<vmem>>, vector<1x8x128xf32>
    %27 = vector.shape_cast %26 : vector<1x8x128xf32> to vector<8x128xf32>
    %28 = vector.shape_cast %25 : vector<8x128xf32> to vector<1x8x128xf32>
    tpu.vector_store %arg4[%c0_9, %c0_10, %c0_11], %28 {strides = array<i32>} : memref<1x8x128xf32, #tpu.memory_space<vmem>>, vector<1x8x128xf32>,
    %c0_12 = arith.constant 0 : index
    %c0_13 = arith.constant 0 : index
    %c0_14 = arith.constant 0 : index
    %29 = vector.load %arg1[%c0_12, %c0_13, %c0_14] : memref<1x16x128xf32, #tpu.memory_space<vmem>>, vector<1x16x128xf32>
    %30 = vector.shape_cast %29 : vector<1x16x128xf32> to vector<16x128xf32>
    %31 = vector.extract_strided_slice %30 {offsets = [0, 0], sizes = [1, 128], strides = [1, 1]} : vector<16x128xf32> to vector<1x128xf32>
    %32 = vector.extract_strided_slice %30 {offsets = [1, 0], sizes = [1, 128], strides = [1, 1]} : vector<16x128xf32> to vector<1x128xf32>
    %33 = vector.extract_strided_slice %30 {offsets = [2, 0], sizes = [1, 128], strides = [1, 1]} : vector<16x128xf32> to vector<1x128xf32>
    %34 = vector.extract_strided_slice %30 {offsets = [3, 0], sizes = [1, 128], strides = [1, 1]} : vector<16x128xf32> to vector<1x128xf32>
    %35 = vector.extract_strided_slice %30 {offsets = [4, 0], sizes = [1, 128], strides = [1, 1]} : vector<16x128xf32> to vector<1x128xf32>
    %36 = vector.extract_strided_slice %30 {offsets = [5, 0], sizes = [1, 128], strides = [1, 1]} : vector<16x128xf32> to vector<1x128xf32>
    %37 = vector.extract_strided_slice %30 {offsets = [6, 0], sizes = [1, 128], strides = [1, 1]} : vector<16x128xf32> to vector<1x128xf32>
    %38 = vector.extract_strided_slice %30 {offsets = [7, 0], sizes = [1, 128], strides = [1, 1]} : vector<16x128xf32> to vector<1x128xf32>
    %39 = vector.extract_strided_slice %30 {offsets = [8, 0], sizes = [1, 128], strides = [1, 1]} : vector<16x128xf32> to vector<1x128xf32>
    %40 = vector.extract_strided_slice %30 {offsets = [9, 0], sizes = [1, 128], strides = [1, 1]} : vector<16x128xf32> to vector<1x128xf32>
    %41 = vector.extract_strided_slice %30 {offsets = [10, 0], sizes = [1, 128], strides = [1, 1]} : vector<16x128xf32> to vector<1x128xf32>
    %cst_15 = arith.constant 5.000000e-01 : f32
    %42 = vector.broadcast %cst_15 : f32 to vector<1x128xf32>
    %43 = arith.mulf %42, %33 : vector<1x128xf32>
    %44 = arith.subf %31, %43 : vector<1x128xf32>
    %cst_16 = arith.constant 5.000000e-01 : f32
    %45 = vector.broadcast %cst_16 : f32 to vector<1x128xf32>
    %46 = arith.mulf %45, %33 : vector<1x128xf32>
    %47 = arith.addf %31, %46 : vector<1x128xf32>
    %cst_17 = arith.constant 5.000000e-01 : f32
    %48 = vector.broadcast %cst_17 : f32 to vector<1x128xf32>
    %49 = arith.mulf %48, %34 : vector<1x128xf32>
    %50 = arith.subf %32, %49 : vector<1x128xf32>
    %cst_18 = arith.constant 5.000000e-01 : f32
    %51 = vector.broadcast %cst_18 : f32 to vector<1x128xf32>
    %52 = arith.mulf %51, %34 : vector<1x128xf32>
    %53 = arith.addf %32, %52 : vector<1x128xf32>
    %cst_19 = arith.constant 5.000000e-01 : f32
    %54 = vector.broadcast %cst_19 : f32 to vector<1x128xf32>
    %55 = arith.mulf %54, %37 : vector<1x128xf32>
    %56 = arith.subf %35, %55 : vector<1x128xf32>
    %cst_20 = arith.constant 5.000000e-01 : f32
    %57 = vector.broadcast %cst_20 : f32 to vector<1x128xf32>
    %58 = arith.mulf %57, %37 : vector<1x128xf32>
    %59 = arith.addf %35, %58 : vector<1x128xf32>
    %cst_21 = arith.constant 5.000000e-01 : f32
    %60 = vector.broadcast %cst_21 : f32 to vector<1x128xf32>
    %61 = arith.mulf %60, %38 : vector<1x128xf32>
    %62 = arith.subf %36, %61 : vector<1x128xf32>
    %cst_22 = arith.constant 5.000000e-01 : f32
    %63 = vector.broadcast %cst_22 : f32 to vector<1x128xf32>
    %64 = arith.mulf %63, %38 : vector<1x128xf32>
    %65 = arith.addf %36, %64 : vector<1x128xf32>
    %66 = arith.minimumf %47, %59 : vector<1x128xf32>
    %67 = arith.maximumf %44, %56 : vector<1x128xf32>
    %68 = arith.subf %66, %67 : vector<1x128xf32>
    %cst_23 = arith.constant 0.000000e+00 : f32
    %69 = vector.broadcast %cst_23 : f32 to vector<1x128xf32>
    %70 = arith.maximumf %68, %69 : vector<1x128xf32>
    %71 = arith.minimumf %53, %65 : vector<1x128xf32>
    %72 = arith.maximumf %50, %62 : vector<1x128xf32>
    %73 = arith.subf %71, %72 : vector<1x128xf32>
    %cst_24 = arith.constant 0.000000e+00 : f32
    %74 = vector.broadcast %cst_24 : f32 to vector<1x128xf32>
    %75 = arith.maximumf %73, %74 : vector<1x128xf32>
    %76 = arith.mulf %70, %75 : vector<1x128xf32>
    %77 = arith.mulf %33, %34 : vector<1x128xf32>
    %78 = arith.mulf %37, %38 : vector<1x128xf32>
    %79 = arith.addf %77, %78 : vector<1x128xf32>
    %80 = arith.subf %79, %76 : vector<1x128xf32>
    %cst_25 = arith.constant 1.000000e-07 : f32
    %81 = vector.broadcast %cst_25 : f32 to vector<1x128xf32>
    %82 = arith.addf %80, %81 : vector<1x128xf32>
    %83 = tpu.reciprocal %82 {approx = true} : vector<1x128xf32> -> vector<1x128xf32>
    %84 = arith.mulf %76, %83 : vector<1x128xf32>
    %85 = arith.maximumf %47, %59 : vector<1x128xf32>
    %86 = arith.minimumf %44, %56 : vector<1x128xf32>
    %87 = arith.subf %85, %86 : vector<1x128xf32>
    %88 = arith.maximumf %53, %65 : vector<1x128xf32>
    %89 = arith.minimumf %50, %62 : vector<1x128xf32>
    %90 = arith.subf %88, %89 : vector<1x128xf32>
    %91 = arith.mulf %87, %87 : vector<1x128xf32>
    %92 = arith.mulf %90, %90 : vector<1x128xf32>
    %93 = arith.addf %91, %92 : vector<1x128xf32>
    %cst_26 = arith.constant 1.000000e-07 : f32
    %94 = vector.broadcast %cst_26 : f32 to vector<1x128xf32>
    %95 = arith.addf %93, %94 : vector<1x128xf32>
    %96 = arith.subf %35, %31 : vector<1x128xf32>
    %97 = arith.subf %35, %31 : vector<1x128xf32>
    %98 = arith.mulf %96, %97 : vector<1x128xf32>
    %99 = arith.subf %36, %32 : vector<1x128xf32>
    %100 = arith.subf %36, %32 : vector<1x128xf32>
    %101 = arith.mulf %99, %100 : vector<1x128xf32>
    %102 = arith.addf %98, %101 : vector<1x128xf32>
    %103 = arith.subf %40, %39 : vector<1x128xf32>
    %cst_27 = arith.constant 0.405284733 : f32
    %104 = vector.broadcast %cst_27 : f32 to vector<1x128xf32>
    %105 = arith.mulf %104, %103 : vector<1x128xf32>
    %106 = arith.mulf %105, %103 : vector<1x128xf32>
    %cst_28 = arith.constant 1.000000e+00 : f32
    %107 = vector.broadcast %cst_28 : f32 to vector<1x128xf32>
    %108 = arith.subf %107, %84 : vector<1x128xf32>
    %109 = arith.addf %108, %106 : vector<1x128xf32>
    %cst_29 = arith.constant 1.000000e-07 : f32
    %110 = vector.broadcast %cst_29 : f32 to vector<1x128xf32>
    %111 = arith.addf %109, %110 : vector<1x128xf32>
    %112 = tpu.reciprocal %111 {approx = true} : vector<1x128xf32> -> vector<1x128xf32>
    %113 = arith.mulf %106, %112 : vector<1x128xf32>
    %114 = tpu.reciprocal %95 {approx = true} : vector<1x128xf32> -> vector<1x128xf32>
    %115 = arith.mulf %102, %114 : vector<1x128xf32>
    %116 = arith.mulf %106, %113 : vector<1x128xf32>
    %117 = arith.addf %115, %116 : vector<1x128xf32>
    %118 = arith.subf %84, %117 : vector<1x128xf32>
    %cst_30 = arith.constant 1.000000e+00 : f32
    %119 = vector.broadcast %cst_30 : f32 to vector<1x128xf32>
    %120 = arith.subf %119, %118 : vector<1x128xf32>
    %121 = arith.subf %35, %31 : vector<1x128xf32>
    %122 = tpu.reciprocal %33 {approx = true} : vector<1x128xf32> -> vector<1x128xf32>
    %123 = arith.mulf %121, %122 : vector<1x128xf32>
    %124 = arith.subf %36, %32 : vector<1x128xf32>
    %125 = tpu.reciprocal %34 {approx = true} : vector<1x128xf32> -> vector<1x128xf32>
    %126 = arith.mulf %124, %125 : vector<1x128xf32>
    %127 = math.log %37 : vector<1x128xf32>
    %128 = math.log %33 : vector<1x128xf32>
    %129 = arith.subf %127, %128 : vector<1x128xf32>
    %130 = math.log %38 : vector<1x128xf32>
    %131 = math.log %34 : vector<1x128xf32>
    %132 = arith.subf %130, %131 : vector<1x128xf32>
    %133 = math.absf %123 : vector<1x128xf32>
    %cst_31 = arith.constant 1.000000e+00 : f32
    %134 = vector.broadcast %cst_31 : f32 to vector<1x128xf32>
    %135 = arith.cmpf olt, %133, %134 : vector<1x128xf32>
    %cst_32 = arith.constant 5.000000e-01 : f32
    %136 = vector.broadcast %cst_32 : f32 to vector<1x128xf32>
    %137 = arith.mulf %136, %123 : vector<1x128xf32>
    %138 = arith.mulf %137, %123 : vector<1x128xf32>
    %cst_33 = arith.constant 5.000000e-01 : f32
    %139 = vector.broadcast %cst_33 : f32 to vector<1x128xf32>
    %140 = arith.subf %133, %139 : vector<1x128xf32>
    %141 = arith.select %135, %138, %140 : vector<1x128xi1>, vector<1x128xf32>
    %142 = math.absf %126 : vector<1x128xf32>
    %cst_34 = arith.constant 1.000000e+00 : f32
    %143 = vector.broadcast %cst_34 : f32 to vector<1x128xf32>
    %144 = arith.cmpf olt, %142, %143 : vector<1x128xf32>
    %cst_35 = arith.constant 5.000000e-01 : f32
    %145 = vector.broadcast %cst_35 : f32 to vector<1x128xf32>
    %146 = arith.mulf %145, %126 : vector<1x128xf32>
    %147 = arith.mulf %146, %126 : vector<1x128xf32>
    %cst_36 = arith.constant 5.000000e-01 : f32
    %148 = vector.broadcast %cst_36 : f32 to vector<1x128xf32>
    %149 = arith.subf %142, %148 : vector<1x128xf32>
    %150 = arith.select %144, %147, %149 : vector<1x128xi1>, vector<1x128xf32>
    %151 = arith.addf %141, %150 : vector<1x128xf32>
    %152 = math.absf %129 : vector<1x128xf32>
    %cst_37 = arith.constant 1.000000e+00 : f32
    %153 = vector.broadcast %cst_37 : f32 to vector<1x128xf32>
    %154 = arith.cmpf olt, %152, %153 : vector<1x128xf32>
    %cst_38 = arith.constant 5.000000e-01 : f32
    %155 = vector.broadcast %cst_38 : f32 to vector<1x128xf32>
    %156 = arith.mulf %155, %129 : vector<1x128xf32>
    %157 = arith.mulf %156, %129 : vector<1x128xf32>
    %cst_39 = arith.constant 5.000000e-01 : f32
    %158 = vector.broadcast %cst_39 : f32 to vector<1x128xf32>
    %159 = arith.subf %152, %158 : vector<1x128xf32>
    %160 = arith.select %154, %157, %159 : vector<1x128xi1>, vector<1x128xf32>
    %161 = arith.addf %151, %160 : vector<1x128xf32>
    %162 = math.absf %132 : vector<1x128xf32>
    %cst_40 = arith.constant 1.000000e+00 : f32
    %163 = vector.broadcast %cst_40 : f32 to vector<1x128xf32>
    %164 = arith.cmpf olt, %162, %163 : vector<1x128xf32>
    %cst_41 = arith.constant 5.000000e-01 : f32
    %165 = vector.broadcast %cst_41 : f32 to vector<1x128xf32>
    %166 = arith.mulf %165, %132 : vector<1x128xf32>
    %167 = arith.mulf %166, %132 : vector<1x128xf32>
    %cst_42 = arith.constant 5.000000e-01 : f32
    %168 = vector.broadcast %cst_42 : f32 to vector<1x128xf32>
    %169 = arith.subf %162, %168 : vector<1x128xf32>
    %170 = arith.select %164, %167, %169 : vector<1x128xi1>, vector<1x128xf32>
    %171 = arith.addf %161, %170 : vector<1x128xf32>
    %c0_43 = arith.constant 0 : index
    %c0_44 = arith.constant 0 : index
    %172 = vector.load %arg6[%c0_43, %c0_44] : memref<1x128xf32, #tpu.memory_space<vmem>>, vector<1x128xf32>
    %173 = arith.mulf %120, %41 : vector<1x128xf32>
    %174 = arith.addf %172, %173 : vector<1x128xf32>
    %c0_45 = arith.constant 0 : index
    %c0_46 = arith.constant 0 : index
    %175 = vector.load %arg6[%c0_45, %c0_46] : memref<1x128xf32, #tpu.memory_space<vmem>>, vector<1x128xf32>
    tpu.vector_store %arg6[%c0_45, %c0_46], %174 {strides = array<i32>} : memref<1x128xf32, #tpu.memory_space<vmem>>, vector<1x128xf32>,
    %c0_47 = arith.constant 0 : index
    %c0_48 = arith.constant 0 : index
    %176 = vector.load %arg7[%c0_47, %c0_48] : memref<1x128xf32, #tpu.memory_space<vmem>>, vector<1x128xf32>
    %177 = arith.mulf %171, %41 : vector<1x128xf32>
    %178 = arith.addf %176, %177 : vector<1x128xf32>
    %c0_49 = arith.constant 0 : index
    %c0_50 = arith.constant 0 : index
    %179 = vector.load %arg7[%c0_49, %c0_50] : memref<1x128xf32, #tpu.memory_space<vmem>>, vector<1x128xf32>
    tpu.vector_store %arg7[%c0_49, %c0_50], %178 {strides = array<i32>} : memref<1x128xf32, #tpu.memory_space<vmem>>, vector<1x128xf32>,
    %c1_i32 = arith.constant 1 : i32
    %180 = arith.cmpi eq, %arg0, %c1_i32 : i32
    %181 = arith.extui %180 : i1 to i32
    %c0_i32_51 = arith.constant 0 : i32
    %182 = arith.cmpi ne, %181, %c0_i32_51 : i32
    scf.if %182 {
      %c0_52 = arith.constant 0 : index
      %c0_53 = arith.constant 0 : index
      %183 = vector.load %arg6[%c0_52, %c0_53] : memref<1x128xf32, #tpu.memory_space<vmem>>, vector<1x128xf32>
      %184 = vector.shape_cast %183 : vector<1x128xf32> to vector<1x1x128xf32>
      %cst_54 = arith.constant dense<0.000000e+00> : vector<1xf32>
      %185 = vector.multi_reduction <add>, %184, %cst_54 [1, 2] : vector<1x1x128xf32> to vector<1xf32>
      %186 = vector.shape_cast %185 : vector<1xf32> to vector<1x1x1xf32>
      %187 = vector.extract %186[0, 0, 0] : f32 from vector<1x1x1xf32>
      %c0_55 = arith.constant 0 : index
      %c0_56 = arith.constant 0 : index
      %188 = vector.load %arg7[%c0_55, %c0_56] : memref<1x128xf32, #tpu.memory_space<vmem>>, vector<1x128xf32>
      %189 = vector.shape_cast %188 : vector<1x128xf32> to vector<1x1x128xf32>
      %cst_57 = arith.constant dense<0.000000e+00> : vector<1xf32>
      %190 = vector.multi_reduction <add>, %189, %cst_57 [1, 2] : vector<1x1x128xf32> to vector<1xf32>
      %191 = vector.shape_cast %190 : vector<1xf32> to vector<1x1x1xf32>
      %192 = vector.extract %191[0, 0, 0] : f32 from vector<1x1x1xf32>
      %193 = tpu.iota {dimensions = array<i32: 1>} : vector<1x128xi32>
      %c0_i32_58 = arith.constant 0 : i32
      %194 = vector.broadcast %c0_i32_58 : i32 to vector<1x128xi32>
      %195 = arith.cmpi eq, %193, %194 : vector<1x128xi32>
      %cst_59 = arith.constant 0.000000e+00 : f32
      %196 = vector.broadcast %187 : f32 to vector<1x128xf32>
      %197 = vector.broadcast %cst_59 : f32 to vector<1x128xf32>
      %198 = arith.select %195, %196, %197 : vector<1x128xi1>, vector<1x128xf32>
      %c1_i32_60 = arith.constant 1 : i32
      %199 = vector.broadcast %c1_i32_60 : i32 to vector<1x128xi32>
      %200 = arith.cmpi eq, %193, %199 : vector<1x128xi32>
      %cst_61 = arith.constant 0.000000e+00 : f32
      %201 = vector.broadcast %192 : f32 to vector<1x128xf32>
      %202 = vector.broadcast %cst_61 : f32 to vector<1x128xf32>
      %203 = arith.select %200, %201, %202 : vector<1x128xi1>, vector<1x128xf32>
      %204 = arith.addf %198, %203 : vector<1x128xf32>
      %c0_62 = arith.constant 0 : index
      %c0_63 = arith.constant 0 : index
      %205 = vector.load %arg5[%c0_62, %c0_63] : memref<1x128xf32, #tpu.memory_space<vmem>>, vector<1x128xf32>
      tpu.vector_store %arg5[%c0_62, %c0_63], %204 {strides = array<i32>} : memref<1x128xf32, #tpu.memory_space<vmem>>, vector<1x128xf32>,
    } else {
    }
    return
  }
  func.func @transform_0(%arg0: i32) -> (i32, i32, i32) {
    %c0_i32 = arith.constant 0 : i32
    %c0_i32_0 = arith.constant 0 : i32
    %c0_i32_1 = arith.constant 0 : i32
    return %arg0, %c0_i32, %c0_i32_0 : i32, i32, i32
  }
  func.func @transform_1(%arg0: i32) -> (i32, i32, i32) {
    %c0_i32 = arith.constant 0 : i32
    %c0_i32_0 = arith.constant 0 : i32
    %c0_i32_1 = arith.constant 0 : i32
    return %arg0, %c0_i32, %c0_i32_0 : i32, i32, i32
  }
  func.func @transform_2(%arg0: i32) -> (i32, i32, i32) {
    %c0_i32 = arith.constant 0 : i32
    %c0_i32_0 = arith.constant 0 : i32
    %c0_i32_1 = arith.constant 0 : i32
    return %arg0, %c0_i32, %c0_i32_0 : i32, i32, i32
  }
  func.func @transform_3(%arg0: i32) -> (i32, i32, i32) {
    %c0_i32 = arith.constant 0 : i32
    %c0_i32_0 = arith.constant 0 : i32
    %c0_i32_1 = arith.constant 0 : i32
    return %arg0, %c0_i32, %c0_i32_0 : i32, i32, i32
  }
  func.func @transform_4(%arg0: i32) -> (i32, i32) {
    %c0_i32 = arith.constant 0 : i32
    %c0_i32_0 = arith.constant 0 : i32
    %c0_i32_1 = arith.constant 0 : i32
    return %c0_i32, %c0_i32_0 : i32, i32
  }
}

</mosaic_0001>

<bundles_post_ra>
// kernel: tpu_custom_call.1
= control target key start
LH: loop header
LB: loop body
LE: loop exit
PB: predicated region body
PF: predicated region fallthrough
CT: control target
= control target key end

     0   :  { %s1170_s0 = inlined_call_operand.hbm [shape: f32[2,16,128], index: 0, kind: input, shape index: {}]   ;;  %s1171_s1 = inlined_call_operand.hbm [shape: f32[2,8,128], index: 1, kind: input, shape index: {}]   ;;  %s1172_s2 = inlined_call_operand.vmem [shape: s32[2,1,128], index: 2, kind: input, shape index: {}]   ;;  %s1173_s3 = inlined_call_operand.hbm [shape: f32[2,8,128], index: 3, kind: output, shape index: {0}]   ;;  %s1174_s4 = inlined_call_operand.hbm [shape: f32[1,128], index: 4, kind: output, shape index: {1}]  }
   0x1   :  { %1178 = sst [smem:[#allocation16_spill]] %s1170_s0 }
   0x2   :  { %10 = vsyncpa [#allocation5], 0 }
   0x3   :  { %12 = vsyncpa [#allocation5 + $0x1], 0 }
   0x4   :  { %13 = vsyncpa [#allocation8], 0 }
   0x5   :  { %15 = vsyncpa [#allocation8 + $0x1], 0 }
   0x6   :  { %16 = vsyncpa [#allocation6], 0 }
   0x7   :  { %18 = vsyncpa [#allocation6 + $0x1], 0 }
   0x8   :  { %19 = vsyncpa [#allocation11], 0  ;;  %s926_s15 = smov 0   ;;  %s928_s16 = smov 0  }
   0x9   :  { %s930_s17 = smov 0   ;;  %s932_s18 = smov 0  }
   0xa LB: > { %s947_s19 = sadd.s32 4294967295, %s891_s18   ;;  %s635_s20 = sadd.s32 4294967294, %s891_s18   ;;  %s891_s18 = sphi %s932_s18, %s1198_s18   ;;  %s887_s17 = sphi %s930_s17, %s1197_s17   ;;  %s883_s16 = sphi %s928_s16, %s1196_s16   ;;  %s879_s15 = sphi %s926_s15, %s1195_s15  }
   0xb   : > { %s951_s21 = sadd.s32 1, %s891_s18   ;;  %s32_s22 = sadd.s32 1, %s887_s17 }
   0xc   : > { %s29_s23 = ssub.s32 %s891_s18, %s951_s21  ;;  %p39_p0 = scmp.ne.s32.totalorder %s887_s17, %s883_s16 }
   0xd   : > { %p30_p1 = scmp.eq.s32.totalorder %s29_s23, 0  ;;  %p40_p2 = scmp.eq.s32.totalorder %s891_s18, 0 }
   0xe   : > { %p45_p3 = scmp.ne.s32.totalorder %s883_s16, %s879_s15  ;;  %p46_p4 = scmp.eq.s32.totalorder %s947_s19, 0 }
   0xf   : > { %s963_s24 = scalar_select %p30_p1, %s887_s17, %s32_s22  }
  0x10   : > { %p965_p5 = por %p40_p2, %p39_p0  ;;  %p969_p6 = por %p46_p4, %p45_p3 }
  0x11   : > { %p1175_p7 = scmp.eq.s32.totalorder %s947_s19, 1  ;;  %p127_p8 = scmp.eq.s32.totalorder %s635_s20, 1 }
  0x12   : > { %s1180_s26 = scalar_select %p969_p6, 1, 0 }
  0x13   : > { %p684_p10 = scmp.lt.s32.totalorder %s891_s18, 2  ;;  %p978_p11 = por %p1175_p7, %p39_p0 }
  0x14   : > { %p982_p12 = por %p127_p8, %p45_p3  ;;  %s987_s29 = sand.u32 1, %s887_s17  }
  0x15   : > { %s1181_s27 = scalar_select %p978_p11, 1, 0 }
  0x16   : > { %s1182_s28 = scalar_select %p982_p12, 1, 0 }
  0x17   : > { %s658_s30 = sshll.u32 %s891_s18, 8  ;;  %s638_s5 = sshll.u32 %s987_s29, 4 }
  0x18   : > { %s1183_s0 = sld [smem:[#allocation16_spill]]  ;;  %s172_s9 = scalar_lea.vmem [#allocation4], %s638_s5 }
  0x19   : > { %s179_s10 = sshll.u32 %s172_s9, 4  ;;  %p998_p13 = pnand %p684_p10, %p965_p5  ;;  %s1002_s10 = int_to_ptr.vmem [resolvable:$true] %s179_s10 }
  0x1a   : > { %s169_s12 = scalar_lea.sflag [#allocation5], %s987_s29 }
  0x1b   : > { %p741_p1 = pneg %p998_p13 }
  0x1e   : > { %s994_s8 = scalar_lea.hbm %s1183_s0, %s658_s30  ;;  %s744_s22 = scalar_lea.hbm %s1183_s0, 512 }
  0x1f   : > { %s739_s13 = scalar_lea.hbm %s994_s8, 256  ;;  %p745_p4 = scmp.lt.s32.totalorder %s994_s8, %s1183_s0 }
  0x20   : > { %p740_p0 = scmp.ne.s32.totalorder %s994_s8, %s739_s13  ;;  %p746_p5 = scmp.lt.s32.totalorder %s744_s22, %s739_s13 }
  0x22   : > { %p742_p2 = pnand %p741_p1, %p740_p0  ;;  %p747_p8 = por %p746_p5, %p745_p4 }
  0x24   : > { %p743_p3 = pneg %p742_p2 }
  0x26   : > { %p748_p10 = pnand %p747_p8, %p743_p3 }
  0x28   : > { %751 = shalt.err (!%p748_p10)
}
  0x29   : > { %s752_s30 = scalar_lea.vmem %s1002_s10, 256  ;;  %s893_s5 = smov [#allocation4]  }
  0x2a   : > { %p753_p9 = scmp.ne.s32.totalorder %s1002_s10, %s752_s30  ;;  %s757_s6 = sshll.u32 %s893_s5, 4  ;;  %s758_s6 = int_to_ptr.vmem [resolvable:$false] %s757_s6 }
  0x2b   : > { %s759_s7 = scalar_lea.vmem %s758_s6, 512  ;;  %p760_p7 = scmp.lt.s32.totalorder %s1002_s10, %s758_s6 }
  0x2c   : > { %p755_p0 = pnand %p753_p9, %p741_p1  ;;  %p761_p12 = scmp.lt.s32.totalorder %s759_s7, %s752_s30 }
  0x2e   : > { %p756_p2 = pneg %p755_p0  ;;  %p762_p11 = por %p761_p12, %p760_p7 }
  0x30   : > { %p763_p4 = pnand %p762_p11, %p756_p2 }
  0x32   : > { %766 = shalt.err (!%p763_p4)
}
  0x33   : > { %s894_s9 = smov 128   ;;  %s895_s13 = smov 8  }
  0x34   : > { %676 = dma.hbm_to_vmem [thread:$0]  (!%p998_p13), %s994_s8, 256, %s1002_s10, %s169_s12, %s894_s9, %s894_s9, %s895_s13  }
  0x35   : > { %p643_p9 = scmp.ge.s32.totalorder %s891_s18, 1  ;;  %p211_p3 = scmp.lt.s32.totalorder %s891_s18, 3 }
  0x36   : > { %s641_s14 = sshll.u32 %s987_s29, 3  ;;  %s642_s22 = sshll.u32 %s891_s18, 7 }
  0x37   : > { %p1034_p7 = pnand %p643_p9, %p211_p3  ;;  %s193_s23 = scalar_lea.vmem [#allocation7], %s641_s14 }
  0x38   : > { %s200_s25 = sshll.u32 %s193_s23, 4  ;;  %s198_s6 = scalar_lea.hbm %s1171_s1, %s642_s22  ;;  %s201_s25 = int_to_ptr.vmem [resolvable:$true] %s200_s25 }
  0x39   : > { %s1185_s20 = scalar_select %p1034_p7, 1, 0 }
  0x3a   : > { %s190_s7 = scalar_lea.sflag [#allocation8], %s987_s29  ;;  %s767_s0 = scalar_lea.hbm %s198_s6, 128 }
  0x3b   : > { %p768_p11 = scmp.ne.s32.totalorder %s198_s6, %s767_s0  ;;  %s772_s12 = scalar_lea.hbm %s1171_s1, 256 }
  0x3c   : > { %p773_p8 = scmp.lt.s32.totalorder %s198_s6, %s1171_s1  ;;  %p774_p10 = scmp.lt.s32.totalorder %s772_s12, %s767_s0 }
  0x3d   : > { %p770_p12 = pnand %p768_p11, %p741_p1 }
  0x3e   : > { %p775_p0 = por %p774_p10, %p773_p8 }
  0x3f   : > { %p771_p5 = pneg %p770_p12 }
  0x41   : > { %p776_p2 = pnand %p775_p0, %p771_p5 }
  0x43   : > { %779 = shalt.err (!%p776_p2)
}
  0x44   : > { %s780_s14 = scalar_lea.vmem %s201_s25, 128  ;;  %s896_s29 = smov [#allocation7]  }
  0x45   : > { %p781_p4 = scmp.ne.s32.totalorder %s201_s25, %s780_s14  ;;  %s785_s22 = sshll.u32 %s896_s29, 4  ;;  %s786_s22 = int_to_ptr.vmem [resolvable:$false] %s785_s22 }
  0x46   : > { %s787_s23 = scalar_lea.vmem %s786_s22, 256  ;;  %p788_p11 = scmp.lt.s32.totalorder %s201_s25, %s786_s22 }
  0x47   : > { %p783_p9 = pnand %p781_p4, %p741_p1  ;;  %p789_p12 = scmp.lt.s32.totalorder %s787_s23, %s780_s14 }
  0x49   : > { %p784_p3 = pneg %p783_p9  ;;  %p790_p6 = por %p789_p12, %p788_p11 }
  0x4b   : > { %p791_p7 = pnand %p790_p6, %p784_p3 }
  0x4d   : > { %794 = shalt.err (!%p791_p7)
}
  0x4e   : > { %679 = dma.hbm_to_vmem [thread:$0]  (!%p998_p13), %s198_s6, 128, %s201_s25, %s190_s7  }
  0x4f   : > { %p1186_p5 = scmp.ne.s32.totalorder %s1185_s20, 0 }
  0x50   : > { %s1060_s0 = sand.u32 (!%p1186_p5), 1, %s883_s16   ;;  %p1187_p1 = scmp.ne.s32.totalorder (!%p1186_p5), %s1180_s26, 0 }
  0x51   : > { %215 = sbr.rel (%p1186_p5) target bundleno = 445 (0x1bd), region = 32  ;;  %s644_s30 = sshll.u32 (!%p1186_p5), %s1060_s0, 4 }
  0x52   : > { %s218_s5 = scalar_lea.sflag (!%p1186_p5), [#allocation5], %s1060_s0  ;;  %s1064_s8 = scalar_lea.vmem (!%p1186_p5), [#allocation4], %s644_s30 }
  0x56   : > { %862 = dma.done.wait (%p1187_p1), %s218_s5, 256  }
  0x57   : > { %864 = vsyncadd (%p1187_p1), %s218_s5, 4294967040  ;;  %s645_s11 = sshll.u32 %s1060_s0, 3  ;;  %s227_s20 = scalar_lea.sflag [#allocation8], %s1060_s0 }
  0x58   : > { %s230_s25 = scalar_lea.vmem [#allocation7], %s645_s11 }
  0x59   : > { %866 = dma.done.wait (%p1187_p1), %s227_s20, 128  }
  0x5a   : > { %868 = vsyncadd (%p1187_p1), %s227_s20, 4294967168  ;;  %p263_p6 = scmp.lt.s32.totalorder %s947_s19, 1  ;;  %s1084_s9 = scalar_lea.vmem [#allocation9], %s645_s11 }
  0x5b   : > { %p647_p13 = scmp.ne.s32.totalorder %s947_s19, 0 }
  0x5c   : > { %s1078_s6 = scalar_select %p263_p6, %s947_s19, 1 }
  0x5d   : > { %269 = sbr.rel (%p647_p13) target bundleno = 100 (0x64), region = 44 }
  0x5e   : > { %s265_s12 = scalar_lea.vmem %s1172_s2, %s1078_s6 }
  0x62   : > { %v897_v0 = vmov 0.0  }
  0x63   : > { %270 = vst [vmem:[#allocation2] sm:$0x1] %v897_v0  ;;  %271 = vst [vmem:[#allocation3] sm:$0x1] %v897_v0 }
  0x64 PF: > { %v1087_v1 = vld [vmem:[%s230_s25] sm:$0xff]  ;;  %v292_v38 = vlaneseq  ;;  %v1103_v40 = vld [vmem:[%s1064_s8 + $0x8] sm:$0xff]  ;;  %v898_v57 = vmov 1966171168   ;;  %p651_p7 = scmp.ne.s32.totalorder %s947_s19, 1 }
  0x65   : > { %v308_v2 = vld [vmem:[%s1064_s8] sm:$0xff]  ;;  %v274_v3 = vrot.slane %v1087_v1, 4  ;;  %v366_v50 = vrot.slane %v1103_v40, 7  ;;  %v648_v55 = vld [vmem:[%s265_s12] ss:$0 sm:$0xff]  ;;  %v444_v58 = vunpack.c.l.s4 %v898_v57 }
  0x66   : > { %v310_v4 = vmul.f32 0.5, %v308_v2  ;;  %725 = vrcp.f32 %v308_v2  ;;  %v331_v10 = vrot.slane %v308_v2, 1  ;;  %v357_v18 = vrot.slane %v308_v2, 4 }
  0x67   : > { %v275_v5 = vmax.f32 %v1087_v1, %v274_v3  ;;  %727 = vlog2.f32 %v308_v2  ;;  %v293_v49 = vshrl.u32 %v292_v38, 7  ;;  %v368_v61 = vsub.f32 %v1103_v40, %v366_v50 }
  0x68   : > { %v312_v6 = vrot.slane %v310_v4, 2  ;;  %v333_v17 = vmul.f32 %v331_v10, %v308_v2  ;;  %v1096_v24 = vsub.f32 %v308_v2, %v357_v18 }
  0x69   : > { %v276_v7 = vrot.slane %v275_v5, 2  ;;  %vm298_vm2 = vcmp.eq.s32.totalorder %v293_v49, %v648_v55 }
  0x6a   : > { %v314_v8 = vsub.f32 %v308_v2, %v312_v6  ;;  %v315_v9 = vadd.f32 %v312_v6, %v308_v2  ;;  %v335_v23 = vrot.slane %v333_v17, 4  ;;  %v438_v2 = vrot.slane %v1103_v40, 6 }
  0x6b   : > { %v277_v11 = vmax.f32 %v275_v5, %v276_v7  ;;  %v445_v6 = vunpack.c.0.s8 %v444_v58 }
  0x6c   : > { %v317_v12 = vrot.slane %v315_v9, 4  ;;  %v321_v13 = vrot.slane %v314_v8, 4  ;;  %v337_v31 = vadd.f32 %v335_v23, %v333_v17 }
  0x6d   : > { %v278_v14 = vrot.slane %v277_v11, 1 }
  0x6e   : > { %v319_v15 = vmin.f32 %v315_v9, %v317_v12  ;;  %v323_v16 = vmax.f32 %v314_v8, %v321_v13  ;;  %v348_v44 = vmax.f32 %v315_v9, %v317_v12  ;;  %v349_v45 = vmin.f32 %v314_v8, %v321_v13 }
  0x6f   : > { %v1092_v19 = vmax.f32 %v277_v11, %v278_v14  ;;  %v299_v8 = vsel %vm298_vm2, %v1087_v1, 0.0  ;;  %v369_v9 = vmul.f32 0.40528473, %v368_v61  ;;  %v448_v14 = vsub.s32 %v445_v6, %v293_v49 }
  0x70   : > { %v324_v20 = vsub.f32 %v319_v15, %v323_v16  ;;  %v350_v56 = vsub.f32 %v348_v44, %v349_v45  ;;  %v300_v15 = vrot.slane %v299_v8, 4 }
  0x71   : > { %v280_v21 = vsub.f32 %v1087_v1, %v1092_v19  ;;  %v370_v17 = vmul.f32 %v369_v9, %v368_v61  ;;  %v431_v61 = vld [vmem:[#allocation2] sm:$0x1] }
  0x72   : > { %v325_v22 = vmax.f32 %v324_v20, 0.0  ;;  %v351_v4 = vmul.f32 %v350_v56, %v350_v56 }
  0x73   : > { %v726_v25 = vpop.eup %725  ;;  %v281_v26 = vmul.f32 1.442695, %v280_v21 }
  0x74   : > { %v327_v27 = vrot.slane %v325_v22, 1  ;;  %v399_v28 = vrot.slane %v726_v25, 6  ;;  %v728_v29 = vpop.eup %727  ;;  %v353_v12 = vrot.slane %v351_v4, 1 }
  0x75   : > { %729 = vpow2.f32 %v281_v26  ;;  %v403_v33 = vmul.f32 0.6931472, %v728_v29  ;;  %v301_v26 = vadd.f32 %v300_v15, %v299_v8  ;;  %v373_v29 = vrot.slane %v370_v17, 1 }
  0x76   : > { %v1098_v30 = vmul.f32 %v327_v27, %v325_v22  ;;  %v401_v32 = vmul.f32 %v399_v28, %v1096_v24  ;;  %v355_v23 = vadd.f32 %v353_v12, %v351_v4  ;;  %v437_v27 = vld [vmem:[#allocation3] sm:$0x1] }
  0x77   : > { %v405_v35 = vrot.slane %v403_v33, 4 }
  0x78   : > { %v339_v34 = vrot.slane %v1098_v30, 6  ;;  %v408_v36 = vand.u32 2147483647, %v401_v32  ;;  %v410_v37 = vmul.f32 0.5, %v401_v32 }
  0x79   : > { %v407_v41 = vsub.f32 %v403_v33, %v405_v35  ;;  %v302_v35 = vrot.slane %v301_v26, 2 }
  0x7a   : > { %v341_v39 = vsub.f32 %v337_v31, %v339_v34  ;;  %vm409_vm0 = vcmp.lt.f32.partialorder %v408_v36, 1.0  ;;  %v411_v42 = vmul.f32 %v410_v37, %v401_v32  ;;  %v649_v46 = vadd.f32 -0.5, %v408_v36 }
  0x7b   : > { %v418_v47 = vand.u32 2147483647, %v407_v41  ;;  %v420_v48 = vmul.f32 0.5, %v407_v41  ;;  %v356_v32 = vadd.f32 1e-07, %v355_v23 }
  0x7c   : > { %v342_v43 = vadd.f32 1e-07, %v341_v39  ;;  %v413_v51 = vsel %vm409_vm0, %v411_v42, %v649_v46  ;;  %v303_v39 = vadd.f32 %v302_v35, %v301_v26  ;;  %v360_v42 = vmul.f32 %v1096_v24, %v1096_v24 }
  0x7d   : > { %v415_v52 = vrot.slane %v413_v51, 1  ;;  %vm419_vm1 = vcmp.lt.f32.partialorder %v418_v47, 1.0  ;;  %v421_v53 = vmul.f32 %v420_v48, %v407_v41  ;;  %v650_v54 = vadd.f32 -0.5, %v418_v47 }
  0x7e   : > { %731 = vrcp.f32 %v342_v43  ;;  %v304_v41 = vrot.slane %v303_v39, 1  ;;  %v362_v46 = vrot.slane %v360_v42, 1 }
  0x7f   : > { %v417_v59 = vadd.f32 %v415_v52, %v413_v51  ;;  %v423_v60 = vsel %vm419_vm1, %v421_v53, %v650_v54 }
  0x80   : > { %v425_v62 = vrot.slane %v423_v60, 2  ;;  %v428_v63 = vrot.slane %v423_v60, 3  ;;  %v305_v44 = vadd.f32 %v304_v41, %v303_v39  ;;  %v364_v50 = vadd.f32 %v362_v46, %v360_v42 }
  0x82   : > { %v730_v0 = vpop.eup %729  ;;  %v427_v5 = vadd.f32 %v425_v62, %v417_v59  ;;  %v432_v59 = vrot.slane %v1103_v40, 2 }
  0x83   : > { %v283_v3 = vrot.slane %v730_v0, 4 }
  0x84   : > { %v430_v10 = vadd.f32 %v428_v63, %v427_v5 }
  0x85   : > { %v284_v7 = vadd.f32 %v730_v0, %v283_v3 }
  0x86   : > { %v440_v13 = vmul.f32 %v438_v2, %v430_v10 }
  0x87   : > { %v285_v11 = vrot.slane %v284_v7, 2 }
  0x88   : > { %v442_v18 = vcombine.high %v440_v13, %v440_v13 }
  0x89   : > { %v286_v16 = vadd.f32 %v285_v11, %v284_v7 }
  0x8a   : > { %v449_v25 = vrot.slane %v442_v18, %v448_v14 }
  0x8b   : > { %v732_v20 = vpop.eup %731  ;;  %v287_v21 = vrot.slane %v286_v16, 1 }
  0x8c   : > { %v345_v22 = vrot.slane %v732_v20, 2  ;;  %v456_v31 = vrot.slane %v449_v25, %v448_v14 }
  0x8d   : > { %v288_v28 = vadd.f32 %v287_v21, %v286_v16 }
  0x8e   : > { %v347_v1 = vmul.f32 %v345_v22, %v1098_v30  ;;  %v458_v34 = vadd.f32 %v456_v31, %v437_v27 }
  0x8f   : > { %733 = vlog2.f32 %v288_v28 }
  0x90   : > { %v371_v33 = vsub.f32 1.0, %v347_v1  ;;  %459 = vst [vmem:[#allocation3] sm:$0x1] %v458_v34  ;;  %735 = vrcp.f32 %v356_v32 }
  0x92   : > { %v375_v36 = vadd.f32 %v373_v29, %v371_v33 }
  0x94   : > { %v376_v37 = vadd.f32 1e-07, %v375_v36 }
  0x96   : > { %737 = vrcp.f32 %v376_v37 }
  0x9c   : > { %v734_v43 = vpop.eup %733 }
  0x9d   : > { %v290_v30 = vmul.f32 0.6931472, %v734_v43  ;;  %v736_v47 = vpop.eup %735 }
  0x9e   : > { %v384_v52 = vrot.slane %v736_v47, 4 }
  0x9f   : > { %v291_v45 = vadd.f32 %v290_v30, %v1092_v19 }
  0xa0   : > { %v386_v54 = vmul.f32 %v384_v52, %v364_v50 }
  0xa1   : > { %v306_v48 = vsub.f32 %v291_v45, %v305_v44 }
  0xa3   : > { %v738_v49 = vpop.eup %737  ;;  %307 = vst [vmem:[%s1084_s9] sm:$0xff] %v306_v48 }
  0xa4   : > { %v379_v51 = vrot.slane %v738_v49, 7 }
  0xa6   : > { %v381_v53 = vmul.f32 %v379_v51, %v370_v17 }
  0xa8   : > { %v387_v55 = vmul.f32 %v381_v53, %v370_v17 }
  0xaa   : > { %v389_v56 = vrot.slane %v387_v55, 5 }
  0xac   : > { %v391_v57 = vadd.f32 %v389_v56, %v386_v54 }
  0xae   : > { %v393_v58 = vrot.slane %v391_v57, 4 }
  0xb0   : > { %v395_v24 = vsub.f32 %v347_v1, %v393_v58 }
  0xb2   : > { %v396_v60 = vsub.f32 1.0, %v395_v24 }
  0xb4   : > { %v434_v19 = vmul.f32 %v432_v59, %v396_v60  ;;  %463 = sbr.rel (%p651_p7) target bundleno = 402 (0x192), region = 48 }
  0xb6   : > { %v435_v62 = vadd.f32 %v434_v19, %v431_v61 }
  0xb8   : > { %436 = vst [vmem:[#allocation2] sm:$0x1] %v435_v62 }
  0xb9   : > { %vm465_vm3 = vcmask 1040384   ;;  %v476_v0 = vld [vmem:[#allocation3] sm:$0x1]  ;;  %v488_v17 = vand.u32 127, %v292_v38 }
  0xba   : > { %v477_v3 = vsel %vm465_vm3, %v476_v0, 0.0 }
  0xbb   : > { %vm489_vm4 = vcmp.eq.s32.totalorder %v488_v17, 0  ;;  %vm492_vm5 = vcmp.eq.s32.totalorder %v488_v17, 1 }
  0xbf   : > { %v464_v63 = vld [vmem:[#allocation2] sm:$0x1] }
  0xc0   : > { %v466_v2 = vsel %vm465_vm3, %v464_v63, 0.0 }
  0xc1   : > { %467 = vadd.xlane.f32.xlu0 %v466_v2 }
  0xc5   : > { %478 = vadd.xlane.f32.xlu0 %v477_v3 }
 0x14a   : > { %v468_v4 = vpop.xlane.xlu0 %467 }
 0x14b   : > { %v469_v5 = vrot.slane %v468_v4, 4 }
 0x14d   : > { %v470_v6 = vadd.f32 %v469_v5, %v468_v4 }
 0x14e   : > { %v479_v7 = vpop.xlane.xlu0 %478 }
 0x14f   : > { %v471_v40 = vrot.slane %v470_v6, 2  ;;  %v480_v8 = vrot.slane %v479_v7, 4 }
 0x151   : > { %v481_v9 = vadd.f32 %v480_v8, %v479_v7  ;;  %v472_v10 = vadd.f32 %v471_v40, %v470_v6 }
 0x153   : > { %v482_v11 = vrot.slane %v481_v9, 2  ;;  %v473_v12 = vrot.slane %v472_v10, 1 }
 0x155   : > { %v483_v13 = vadd.f32 %v482_v11, %v481_v9  ;;  %v474_v14 = vadd.f32 %v473_v12, %v472_v10 }
 0x157   : > { %659 = vpush %v474_v14  ;;  %v484_v15 = vrot.slane %v483_v13, 1 }
 0x159   : > { %v485_v16 = vadd.f32 %v484_v15, %v483_v13 }
 0x15b   : > { %661 = vpush %v485_v16 }
 0x188   : > { %s660_s14 = spop %659 }
 0x189   : > { %v490_v18 = vstv %s660_s14 }
 0x18a   : > { %v491_v21 = vsel %vm489_vm4, %v490_v18, 0.0 }
 0x18c   : > { %s662_s29 = spop %661 }
 0x18d   : > { %v493_v20 = vstv %s662_s29 }
 0x18e   : > { %v494_v22 = vsel %vm492_vm5, %v493_v20, 0.0 }
 0x18f   : > { %v495_v23 = vadd.f32 %v494_v22, %v491_v21 }
 0x191   : > { %496 = vst [vmem:[#allocation10] sm:$0x1] %v495_v23 }
 0x192 PF: > { %s653_s22 = sshll.u32 %s947_s19, 7  ;;  %s511_s8 = sshll.u32 %s1084_s9, 4  ;;  %s512_s8 = int_to_ptr.vmem [resolvable:$true] %s511_s8 }
 0x193   : > { %s509_s5 = scalar_lea.hbm %s1173_s3, %s653_s22  ;;  %s498_s11 = scalar_lea.sflag [#allocation6], %s1060_s0 }
 0x194   : > { %s795_s20 = scalar_lea.vmem %s512_s8, 128  ;;  %p1188_p10 = scmp.ne.s32.totalorder %s1181_s27, 0 }
 0x195   : > { %p796_p8 = scmp.ne.s32.totalorder %s512_s8, %s795_s20  ;;  %s899_s25 = smov [#allocation9]  }
 0x196   : > { %s799_s6 = sshll.u32 %s899_s25, 4  ;;  %s800_s6 = int_to_ptr.vmem [resolvable:$false] %s799_s6 }
 0x197   : > { %p797_p0 = pnand %p796_p8, %p1188_p10  ;;  %s801_s7 = scalar_lea.vmem %s800_s6, 256 }
 0x198   : > { %p802_p4 = scmp.lt.s32.totalorder %s512_s8, %s800_s6  ;;  %p803_p9 = scmp.lt.s32.totalorder %s801_s7, %s795_s20 }
 0x199   : > { %p798_p2 = pneg %p797_p0 }
 0x19a   : > { %p804_p3 = por %p803_p9, %p802_p4 }
 0x19c   : > { %p805_p11 = pnand %p804_p3, %p798_p2 }
 0x19e   : > { %808 = shalt.err (!%p805_p11)
}
 0x19f   : > { %s809_s10 = scalar_lea.hbm %s509_s5, 128  ;;  %s813_s9 = scalar_lea.hbm %s1173_s3, 256 }
 0x1a0   : > { %p810_p12 = scmp.ne.s32.totalorder %s509_s5, %s809_s10  ;;  %p814_p6 = scmp.lt.s32.totalorder %s509_s5, %s1173_s3 }
 0x1a1   : > { %p815_p13 = scmp.lt.s32.totalorder %s813_s9, %s809_s10 }
 0x1a2   : > { %p811_p5 = pnand %p810_p12, %p1188_p10 }
 0x1a3   : > { %p816_p7 = por %p815_p13, %p814_p6 }
 0x1a4   : > { %p812_p1 = pneg %p811_p5 }
 0x1a6   : > { %p817_p8 = pnand %p816_p7, %p812_p1 }
 0x1a8   : > { %820 = shalt.err (!%p817_p8)
}
 0x1a9   : > { %667 = dma.vmem_to_hbm [thread:$0]  (%p1188_p10), %s512_s8, 128, %s509_s5, %s498_s11  }
 0x1aa   : > { %s900_s14 = smov [#allocation10]   ;;  %p1189_p2 = scmp.eq.s32.totalorder %s947_s19, 1 }
 0x1ab   : > { %s522_s29 = sshll.u32 %s900_s14, 4  ;;  %s523_s29 = int_to_ptr.vmem [resolvable:$true] %s522_s29 }
 0x1ac   : > { %s821_s22 = scalar_lea.vmem %s523_s29, 16  ;;  %s827_s23 = scalar_lea.vmem %s523_s29, 32 }
 0x1ad   : > { %p822_p0 = scmp.ne.s32.totalorder %s523_s29, %s821_s22  ;;  %p828_p3 = scmp.lt.s32.totalorder %s523_s29, %s523_s29 }
 0x1ae   : > { %p829_p11 = scmp.lt.s32.totalorder %s827_s23, %s821_s22 }
 0x1af   : > { %p823_p4 = pnand %p822_p0, %p1189_p2 }
 0x1b0   : > { %p830_p12 = por %p829_p11, %p828_p3 }
 0x1b1   : > { %p824_p9 = pneg %p823_p4 }
 0x1b3   : > { %p831_p5 = pnand %p830_p12, %p824_p9 }
 0x1b5   : > { %834 = shalt.err (!%p831_p5)
}
 0x1b6   : > { %p1190_p1 = pmov %p1189_p2 }
 0x1b8   : > { %669 = dma.vmem_to_hbm [thread:$0]  (%p1190_p1), %s523_s29, 16, %s1174_s4, [#allocation11]  }
 0x1b9   : > { %p1191_p10 = pmov %p1190_p1 }
 0x1ba   : > { %p1192_p6 = pmov %p1190_p1 }
 0x1bb   : > { %870 = dma.done.wait (%p1191_p10), [#allocation11], 16  }
 0x1bc   : > { %872 = vsyncadd (%p1192_p6), [#allocation11], 4294967280 }
 0x1bd PF: > { %s538_s5 = sand.u32 1, %s879_s15   ;;  %p1193_p13 = scmp.ne.s32.totalorder %s1182_s28, 0 }
 0x1be   : > { %p1194_p7 = scmp.ge.s32.totalorder %s891_s18, 2  ;;  %s539_s8 = scalar_lea.sflag [#allocation6], %s538_s5 }
 0x1c0   : > { %p681_p8 = pnand %p1194_p7, %p1193_p13 }
 0x1c2   : > { %p682_p0 = pneg %p681_p8 }
 0x1c4   : > { %874 = dma.done.wait (%p682_p0), %s539_s8, 128  }
 0x1c5   : > { %876 = vsyncadd (%p682_p0), %s539_s8, 4294967168  ;;  %p22_p2 = scmp.ge.s32.totalorder %s951_s21, 4   ;;  %s1195_s15 = smov %s883_s16 }
 0x1c6   : > { %s1196_s16 = smov %s887_s17  ;;  %s1197_s17 = smov %s963_s24 }
 0x1c7   : > { %s1198_s18 = smov %s951_s21  ;;  %24 = sbr.rel (!%p22_p2) target bundleno = 10 (0xa), region = 109 }
 0x1cc   :  { %544 = vsyncpa [#allocation5], 1 }
 0x1cd   :  { %546 = vsyncpa [#allocation5 + $0x1], 1 }
 0x1ce   :  { %547 = vsyncpa [#allocation8], 1 }
 0x1cf   :  { %549 = vsyncpa [#allocation8 + $0x1], 1 }
 0x1d0   :  { %550 = vsyncpa [#allocation6], 1 }
 0x1d1   :  { %552 = vsyncpa [#allocation6 + $0x1], 1 }
 0x1d2   :  { %553 = vsyncpa [#allocation11], 1 }

</bundles_post_ra>
